<compile_context>
chip_gen: v6e
topology: v6e:2x2x1
jax: 0.10.0
libtpu: 0.0.40
codegen_flags: <defaults>
</compile_context>

<pallas_src>
import functools

import jax
import jax.numpy as jnp
from jax import lax
from jax.experimental import pallas as pl
from jax.experimental.pallas import tpu as pltpu


def _concat_pool_kernel(x_ref, max_ref, avg_ref, max_acc, sum_acc, *,
                        ts, s_true, inv_count, needs_mask):
    """One (row-tile, spatial-tile) grid step of global max/avg pooling."""
    s_idx = pl.program_id(1)

    @pl.when(s_idx == 0)
    def _():
        max_acc[...] = jnp.full_like(max_acc, -jnp.inf)
        sum_acc[...] = jnp.zeros_like(sum_acc)

    x = x_ref[...].astype(jnp.float32)                      # (TR, TS)

    if needs_mask:
        # Only needed when the spatial axis was zero-padded: padded zeros must
        # not raise the max (they do not affect the sum, we divide by true S).
        col = s_idx * ts + lax.broadcasted_iota(jnp.int32, x.shape, 1)
        x_for_max = jnp.where(col < s_true, x, -jnp.inf)
    else:
        x_for_max = x

    max_acc[...] = jnp.maximum(max_acc[...],
                               jnp.max(x_for_max, axis=-1, keepdims=True))
    sum_acc[...] = sum_acc[...] + jnp.sum(x, axis=-1, keepdims=True)

    @pl.when(s_idx == pl.num_programs(1) - 1)
    def _():
        max_ref[...] = max_acc[...].astype(max_ref.dtype)
        avg_ref[...] = (sum_acc[...] * inv_count).astype(avg_ref.dtype)


def _round_up(a, b):
    return (a + b - 1) // b * b


def adaptive_concat_pool2d(x):
    """JAX/Pallas equivalent of AdaptiveConcatPool2d()(x) with sz=(1,1)."""
    # TODO(synk): general adaptive output sizes (sz != (1,1)) are not implemented;
    # the module's default global pooling is.
    B, C, H, W = x.shape
    R, S = B * C, H * W
    x2 = x.reshape(R, S)

    itemsize = x.dtype.itemsize
    MAX_TS = 2048                    # spatial tile (multiple of 128)
    TARGET_BLOCK_BYTES = 1 << 20     # ~1 MiB per input block (double-buffered)

    # Spatial tiling (reduction axis).
    if S <= MAX_TS:
        TS, S_pad = S, S             # full-dim block: no 128 divisibility needed
    else:
        TS = MAX_TS
        S_pad = _round_up(S, TS)
    needs_mask = S_pad != S

    # Row tiling (parallel axis), multiple of 8 sublanes.
    TR = max(8, (TARGET_BLOCK_BYTES // max(1, TS * itemsize)) // 8 * 8)
    TR = min(TR, _round_up(R, 8), 1024)
    R_pad = _round_up(R, TR)

    if (R_pad, S_pad) != (R, S):
        x2 = jnp.pad(x2, ((0, R_pad - R), (0, S_pad - S)))

    grid = (R_pad // TR, S_pad // TS)

    kernel = functools.partial(
        _concat_pool_kernel,
        ts=int(TS), s_true=int(S), inv_count=1.0 / float(S),
        needs_mask=bool(needs_mask))

    max_out, avg_out = pl.pallas_call(
        kernel,
        out_shape=(jax.ShapeDtypeStruct((R_pad, 1), x.dtype),
                   jax.ShapeDtypeStruct((R_pad, 1), x.dtype)),
        grid_spec=pltpu.PrefetchScalarGridSpec(
            num_scalar_prefetch=0,
            grid=grid,
            in_specs=[pl.BlockSpec((TR, TS), lambda r, s: (r, s))],
            out_specs=(pl.BlockSpec((TR, 1), lambda r, s: (r, 0)),
                       pl.BlockSpec((TR, 1), lambda r, s: (r, 0))),
            scratch_shapes=[pltpu.VMEM((TR, 1), jnp.float32),
                            pltpu.VMEM((TR, 1), jnp.float32)]),
        compiler_params=pltpu.CompilerParams(
            dimension_semantics=("parallel", "arbitrary")),
    )(x2)

    mp = max_out[:R].reshape(B, C, 1, 1)
    ap = avg_out[:R].reshape(B, C, 1, 1)
    return jnp.concatenate([mp, ap], axis=1)          # (B, 2C, 1, 1), max first


def _reference(x):
    mp = jnp.max(x, axis=(2, 3), keepdims=True)
    ap = jnp.mean(x, axis=(2, 3), keepdims=True)
    return jnp.concatenate([mp, ap], axis=1)


if __name__ == "__main__":
    key = jax.random.PRNGKey(0)
    k1, k2 = jax.random.split(key)

    # Case 1: module-default small shape (B=2, C=4, H=W=16).
    x1 = jax.random.normal(k1, (2, 4, 16, 16), dtype=jnp.float32)
    out1 = jax.block_until_ready(adaptive_concat_pool2d(x1))
    ref1 = _reference(x1)
    assert out1.shape == (2, 8, 1, 1)
    assert jnp.allclose(out1, ref1, atol=1e-4, rtol=1e-4), "mismatch (case 1)"

    # Case 2: ragged shape exercising row padding, spatial tiling and masking
    # (H*W = 2500 > 2048 -> two spatial tiles, padded last tile).
    x2 = jax.random.normal(k2, (2, 3, 50, 50), dtype=jnp.float32)
    out2 = jax.block_until_ready(adaptive_concat_pool2d(x2))
    ref2 = _reference(x2)
    assert out2.shape == (2, 6, 1, 1)
    assert jnp.allclose(out2, ref2, atol=1e-4, rtol=1e-4), "mismatch (case 2)"

    print("KERNEL_OK")
</pallas_src>

<mosaic_0001>
module attributes {stable_mosaic.version = 11 : i64} {
  func.func @_concat_pool_kernel(%arg0: i32, %arg1: i32, %arg2: memref<8x256xf32, #tpu.memory_space<vmem>>, %arg3: memref<8x1xf32, #tpu.memory_space<vmem>>, %arg4: memref<8x1xf32, #tpu.memory_space<vmem>>, %arg5: memref<8x1xf32, #tpu.memory_space<vmem>>, %arg6: memref<8x1xf32, #tpu.memory_space<vmem>>) attributes {dimension_semantics = [#tpu.dimension_semantics<parallel>, #tpu.dimension_semantics<arbitrary>], iteration_bounds = array<i64: 1, 1>, scalar_prefetch = 0 : i64, scratch_operands = 2 : i64, tpu.core_type = #tpu.core_type<tc>, window_params = [{transform_indices = @transform_0, window_bounds = array<i64: 8, 256>}, {transform_indices = @transform_1, window_bounds = array<i64: 8, 1>}, {transform_indices = @transform_2, window_bounds = array<i64: 8, 1>}]} {
    %c0_i32 = arith.constant 0 : i32
    %0 = arith.cmpi eq, %arg1, %c0_i32 : i32
    %1 = arith.extui %0 : i1 to i32
    %c0_i32_0 = arith.constant 0 : i32
    %2 = arith.cmpi ne, %1, %c0_i32_0 : i32
    scf.if %2 {
      %cst_13 = arith.constant 0xFF800000 : f32
      %17 = vector.broadcast %cst_13 : f32 to vector<8x1xf32>
      %c0_14 = arith.constant 0 : index
      %c0_15 = arith.constant 0 : index
      %18 = vector.load %arg5[%c0_14, %c0_15] : memref<8x1xf32, #tpu.memory_space<vmem>>, vector<8x1xf32>
      tpu.vector_store %arg5[%c0_14, %c0_15], %17 {strides = array<i32>} : memref<8x1xf32, #tpu.memory_space<vmem>>, vector<8x1xf32>,
      %cst_16 = arith.constant 0.000000e+00 : f32
      %19 = vector.broadcast %cst_16 : f32 to vector<8x1xf32>
      %c0_17 = arith.constant 0 : index
      %c0_18 = arith.constant 0 : index
      %20 = vector.load %arg6[%c0_17, %c0_18] : memref<8x1xf32, #tpu.memory_space<vmem>>, vector<8x1xf32>
      tpu.vector_store %arg6[%c0_17, %c0_18], %19 {strides = array<i32>} : memref<8x1xf32, #tpu.memory_space<vmem>>, vector<8x1xf32>,
    } else {
    }
    %c0 = arith.constant 0 : index
    %c0_1 = arith.constant 0 : index
    %3 = vector.load %arg2[%c0, %c0_1] : memref<8x256xf32, #tpu.memory_space<vmem>>, vector<8x256xf32>
    %c0_2 = arith.constant 0 : index
    %c0_3 = arith.constant 0 : index
    %4 = vector.load %arg5[%c0_2, %c0_3] : memref<8x1xf32, #tpu.memory_space<vmem>>, vector<8x1xf32>
    %cst = arith.constant dense<0xFF800000> : vector<8xf32>
    %5 = vector.multi_reduction <maximumf>, %3, %cst [1] : vector<8x256xf32> to vector<8xf32>
    %6 = vector.shape_cast %5 : vector<8xf32> to vector<8x1xf32>
    %7 = arith.maximumf %4, %6 : vector<8x1xf32>
    %c0_4 = arith.constant 0 : index
    %c0_5 = arith.constant 0 : index
    %8 = vector.load %arg5[%c0_4, %c0_5] : memref<8x1xf32, #tpu.memory_space<vmem>>, vector<8x1xf32>
    tpu.vector_store %arg5[%c0_4, %c0_5], %7 {strides = array<i32>} : memref<8x1xf32, #tpu.memory_space<vmem>>, vector<8x1xf32>,
    %c0_6 = arith.constant 0 : index
    %c0_7 = arith.constant 0 : index
    %9 = vector.load %arg6[%c0_6, %c0_7] : memref<8x1xf32, #tpu.memory_space<vmem>>, vector<8x1xf32>
    %cst_8 = arith.constant dense<0.000000e+00> : vector<8xf32>
    %10 = vector.multi_reduction <add>, %3, %cst_8 [1] : vector<8x256xf32> to vector<8xf32>
    %11 = vector.shape_cast %10 : vector<8xf32> to vector<8x1xf32>
    %12 = arith.addf %9, %11 : vector<8x1xf32>
    %c0_9 = arith.constant 0 : index
    %c0_10 = arith.constant 0 : index
    %13 = vector.load %arg6[%c0_9, %c0_10] : memref<8x1xf32, #tpu.memory_space<vmem>>, vector<8x1xf32>
    tpu.vector_store %arg6[%c0_9, %c0_10], %12 {strides = array<i32>} : memref<8x1xf32, #tpu.memory_space<vmem>>, vector<8x1xf32>,
    %c0_i32_11 = arith.constant 0 : i32
    %14 = arith.cmpi eq, %arg1, %c0_i32_11 : i32
    %15 = arith.extui %14 : i1 to i32
    %c0_i32_12 = arith.constant 0 : i32
    %16 = arith.cmpi ne, %15, %c0_i32_12 : i32
    scf.if %16 {
      %c0_13 = arith.constant 0 : index
      %c0_14 = arith.constant 0 : index
      %17 = vector.load %arg5[%c0_13, %c0_14] : memref<8x1xf32, #tpu.memory_space<vmem>>, vector<8x1xf32>
      %c0_15 = arith.constant 0 : index
      %c0_16 = arith.constant 0 : index
      %18 = vector.load %arg3[%c0_15, %c0_16] : memref<8x1xf32, #tpu.memory_space<vmem>>, vector<8x1xf32>
      tpu.vector_store %arg3[%c0_15, %c0_16], %17 {strides = array<i32>} : memref<8x1xf32, #tpu.memory_space<vmem>>, vector<8x1xf32>,
      %c0_17 = arith.constant 0 : index
      %c0_18 = arith.constant 0 : index
      %19 = vector.load %arg6[%c0_17, %c0_18] : memref<8x1xf32, #tpu.memory_space<vmem>>, vector<8x1xf32>
      %cst_19 = arith.constant 3.906250e-03 : f32
      %20 = vector.broadcast %cst_19 : f32 to vector<8x1xf32>
      %21 = arith.mulf %19, %20 : vector<8x1xf32>
      %c0_20 = arith.constant 0 : index
      %c0_21 = arith.constant 0 : index
      %22 = vector.load %arg4[%c0_20, %c0_21] : memref<8x1xf32, #tpu.memory_space<vmem>>, vector<8x1xf32>
      tpu.vector_store %arg4[%c0_20, %c0_21], %21 {strides = array<i32>} : memref<8x1xf32, #tpu.memory_space<vmem>>, vector<8x1xf32>,
    } else {
    }
    return
  }
  func.func @transform_0(%arg0: i32, %arg1: i32) -> (i32, i32) {
    %c0_i32 = arith.constant 0 : i32
    return %arg0, %arg1 : i32, i32
  }
  func.func @transform_1(%arg0: i32, %arg1: i32) -> (i32, i32) {
    %c0_i32 = arith.constant 0 : i32
    %c0_i32_0 = arith.constant 0 : i32
    return %arg0, %c0_i32 : i32, i32
  }
  func.func @transform_2(%arg0: i32, %arg1: i32) -> (i32, i32) {
    %c0_i32 = arith.constant 0 : i32
    %c0_i32_0 = arith.constant 0 : i32
    return %arg0, %c0_i32 : i32, i32
  }
}

</mosaic_0001>

<bundles_post_ra>
// kernel: tpu_custom_call.1
= control target key start
LH: loop header
LB: loop body
LE: loop exit
PB: predicated region body
PF: predicated region fallthrough
CT: control target
= control target key end

     0   :  { %8 = vsyncpa [#allocation5], 0  ;;  %s86_s9 = smov [#allocation4]   ;;  %s119_s0 = inlined_call_operand.hbm [shape: f32[8,256], index: 0, kind: input, shape index: {}]   ;;  %s120_s1 = inlined_call_operand.vmem [shape: f32[8,1], index: 1, kind: output, shape index: {0}]   ;;  %s121_s2 = inlined_call_operand.vmem [shape: f32[8,1], index: 2, kind: output, shape index: {1}]  }
   0x1   :  { %s15_s10 = sshll.u32 %s86_s9, 4  ;;  %s16_s10 = int_to_ptr.vmem [resolvable:$true] %s15_s10 }
   0x2   :  { %s72_s11 = scalar_lea.vmem %s16_s10, 256  ;;  %p77_p1 = scmp.lt.s32.totalorder %s16_s10, %s16_s10 }
   0x3   :  { %p73_p0 = scmp.ne.s32.totalorder %s16_s10, %s72_s11  ;;  %p78_p2 = scmp.lt.s32.totalorder %s72_s11, %s72_s11 }
   0x5   :  { %p79_p3 = por %p78_p2, %p77_p1 }
   0x7   :  { %p80_p4 = pnand %p79_p3, %p73_p0 }
   0x9   :  { %83 = shalt.err (!%p80_p4)
}
   0xa   :  { %18 = dma.hbm_to_vmem [thread:$0]  %s119_s0, 256, %s16_s10, [#allocation5]  }
   0xb   :  { %84 = dma.done.wait [#allocation5], 256  }
   0xc   :  { %85 = vsyncadd [#allocation5], 4294967040  ;;  %vm26_vm0 = vcmask 7168   ;;  %v87_v0 = vmov 0.0   ;;  %v29_v1 = vld [vmem:[#allocation4] sm:$0xff]  ;;  %v30_v2 = vld [vmem:[#allocation4 + $0x8] sm:$0xff] }
   0xd   :  { %28 = vst.msk [vmem:[#allocation3] sm:$0xff] %vm26_vm0, %v87_v0  ;;  %v39_v3 = vadd.f32 %v30_v2, %v29_v1  ;;  %v32_v4 = vmax.f32 %v29_v1, %v30_v2  ;;  %v88_v5 = vmov -inf  }
   0xe   :  { %27 = vst.msk [vmem:[#allocation2] sm:$0xff] %vm26_vm0, %v88_v5 }
   0xf   :  { %40 = vadd.xlane.f32.xlu0 %v39_v3 }
  0x13   :  { %33 = vmax.xlane.f32.xlu0 %v32_v4 }
  0x14   :  { %v38_v6 = vld [vmem:[#allocation3] sm:$0xff] }
  0x15   :  { %v31_v9 = vld [vmem:[#allocation2] sm:$0xff] }
  0x98   :  { %v41_v7 = vpop.xlane.xlu0 %40 }
  0x99   :  { %v42_v8 = vadd.f32 %v41_v7, %v38_v6 }
  0x9b   :  { %43 = vst.msk [vmem:[#allocation3] sm:$0xff] %vm26_vm0, %v42_v8 }
  0x9c   :  { %v34_v10 = vpop.xlane.xlu0 %33 }
  0x9d   :  { %v35_v11 = vmax.f32 %v31_v9, %v34_v10 }
  0x9f   :  { %37 = vst.msk [vmem:[#allocation2] sm:$0xff] %vm26_vm0, %v35_v11 }
  0xa2   :  { %v49_v12 = vld [vmem:[#allocation3] sm:$0xff] }
  0xa3   :  { %v50_v13 = vmul.f32 0.00390625, %v49_v12 }
  0xa5   :  { %51 = vst.msk [vmem:[%s121_s2] sm:$0xff] %vm26_vm0, %v50_v13 }
  0xa6   :  { %v47_v14 = vld [vmem:[#allocation2] sm:$0xff] }
  0xa7   :  { %48 = vst.msk [vmem:[%s120_s1] sm:$0xff] %vm26_vm0, %v47_v14 }
  0xa8   :  { %60 = vsyncpa [#allocation5], 1 }

</bundles_post_ra>
